<compile_context>
chip_gen: v7x
topology: tpu7x:2x2x1
jax: 0.10.0
libtpu: 0.0.40
codegen_flags: <defaults>
</compile_context>

<pallas_src>
import functools

import numpy as np

import jax
import jax.numpy as jnp
from jax import lax
from jax.experimental import pallas as pl
from jax.experimental.pallas import tpu as pltpu


# ----------------------------------------------------------------------------
# Kernel
# ----------------------------------------------------------------------------
def _encoder_fused_kernel(num_layers, *refs):
    """Fused Conv1d(s=2,k=3,p=1) + LayerNorm(L) + LeakyReLU, one sample/step.

    refs layout:
      refs[0]                      : x_ref   (C0, L0)
      refs[1 + 4*l .. 4 + 4*l]     : per-layer [w_stack (3,C_out,C_in),
                                                tap_sel (3,L_in,L_out),
                                                gamma (1,L_out), beta (1,L_out)]
      refs[1 + 4*num_layers]       : out_ref (C_last, L_last)
    """
    out_ref = refs[1 + 4 * num_layers]

    a = refs[0][...].astype(jnp.float32)  # (C_in, L_in), lives in VMEM/vregs

    for li in range(num_layers):
        w_ref, s_ref, g_ref, b_ref = refs[1 + 4 * li: 5 + 4 * li]
        c_out = w_ref.shape[1]
        l_out = s_ref.shape[2]

        # Conv1d as 3 shifted/strided taps.  S_k is a tiny constant 0/1
        # selection matrix implementing the stride-2, pad-1 index map
        # (padding taps are zero columns):  y += W[:, :, k] @ (A @ S_k).
        y = jnp.zeros((c_out, l_out), jnp.float32)
        for k in range(3):
            tap = jnp.dot(a, s_ref[k], preferred_element_type=jnp.float32)
            y = y + jnp.dot(w_ref[k], tap, preferred_element_type=jnp.float32)

        # NOTE: Conv1d bias intentionally omitted — constant along the
        # LayerNorm-normalized axis, so LayerNorm cancels it exactly.

        # LayerNorm over the length (lane) axis: XLU reduction + EUP rsqrt.
        mean = jnp.mean(y, axis=-1, keepdims=True)
        cen = y - mean
        var = jnp.mean(cen * cen, axis=-1, keepdims=True)
        y = cen * lax.rsqrt(var + 1e-5)
        y = y * g_ref[...] + b_ref[...]

        # LeakyReLU (negative_slope = 0.01) on the VPU.
        a = jnp.where(y >= 0, y, 0.01 * y)

    out_ref[...] = a.astype(out_ref.dtype)


# ----------------------------------------------------------------------------
# Host-side constant builders (constant-folded under jit)
# ----------------------------------------------------------------------------
def _make_tap_selectors(l_in, l_out):
    """(3, l_in, l_out): S_k[i, t] = 1 iff i == 2t + k - 1 (pad=1, stride=2)."""
    s = np.zeros((3, l_in, l_out), np.float32)
    for k in range(3):
        for t in range(l_out):
            src = 2 * t + k - 1
            if 0 <= src < l_in:
                s[k, src, t] = 1.0
    return jnp.asarray(s)


# ----------------------------------------------------------------------------
# Wrapper
# ----------------------------------------------------------------------------
def encoder_forward(x, params):
    """x: (N, C_in, L) -> (N, hidden_dims[-1], L // 2**len(hidden_dims))."""
    n, c0, l0 = x.shape
    num_layers = len(params)

    operands = [x.astype(jnp.float32)]
    in_specs = [pl.BlockSpec((None, c0, l0), lambda i: (i, 0, 0))]

    c_in, l_in = c0, l0
    for (w, _b, gamma, beta) in params:
        c_out = w.shape[0]
        l_out = (l_in + 2 - 3) // 2 + 1
        assert gamma.shape[0] == l_out and beta.shape[0] == l_out

        w_stack = jnp.transpose(w, (2, 0, 1)).astype(jnp.float32)  # (3, C_out, C_in)
        s_stack = _make_tap_selectors(l_in, l_out)                 # (3, L_in, L_out)
        g_row = gamma.astype(jnp.float32).reshape(1, l_out)
        b_row = beta.astype(jnp.float32).reshape(1, l_out)

        operands += [w_stack, s_stack, g_row, b_row]
        # Constant block index across grid steps => stays resident in VMEM.
        in_specs += [
            pl.BlockSpec((3, c_out, c_in), lambda i: (0, 0, 0)),
            pl.BlockSpec((3, l_in, l_out), lambda i: (0, 0, 0)),
            pl.BlockSpec((1, l_out), lambda i: (0, 0)),
            pl.BlockSpec((1, l_out), lambda i: (0, 0)),
        ]
        c_in, l_in = c_out, l_out

    out_shape = jax.ShapeDtypeStruct((n, c_in, l_in), jnp.float32)
    out_spec = pl.BlockSpec((None, c_in, l_in), lambda i: (i, 0, 0))

    kernel = functools.partial(_encoder_fused_kernel, num_layers)
    return pl.pallas_call(
        kernel,
        out_shape=out_shape,
        grid_spec=pltpu.PrefetchScalarGridSpec(
            num_scalar_prefetch=0,
            grid=(n,),
            in_specs=in_specs,
            out_specs=out_spec,
        ),
        compiler_params=pltpu.CompilerParams(
            dimension_semantics=("parallel",)),
    )(*operands)


encoder_forward = jax.jit(encoder_forward)


# ----------------------------------------------------------------------------
# Parameters + pure-JAX reference
# ----------------------------------------------------------------------------
def init_encoder_params(key, in_channels, hidden_dims, length):
    """Deterministic synthetic parameters (shapes match the PyTorch module)."""
    params = []
    c_in = in_channels
    l = length
    for h_dim in hidden_dims:
        l = l // 2
        key, kw, kb, kg, kbt = jax.random.split(key, 5)
        w = 0.1 * jax.random.normal(kw, (h_dim, c_in, 3), dtype=jnp.float32)
        b = 0.1 * jax.random.normal(kb, (h_dim,), dtype=jnp.float32)
        # nn.LayerNorm default init is ones/zeros; perturb slightly so the
        # affine path of the kernel is actually exercised by the test.
        gamma = 1.0 + 0.1 * jax.random.normal(kg, (l,), dtype=jnp.float32)
        beta = 0.1 * jax.random.normal(kbt, (l,), dtype=jnp.float32)
        params.append((w, b, gamma, beta))
        c_in = h_dim
    return params


def encoder_forward_ref(x, params):
    """Pure-JAX reference (includes the conv bias, which LayerNorm cancels)."""
    for (w, b, gamma, beta) in params:
        y = lax.conv_general_dilated(
            x, w, window_strides=(2,), padding=((1, 1),),
            dimension_numbers=("NCH", "OIH", "NCH"))
        y = y + b[None, :, None]
        mean = jnp.mean(y, axis=-1, keepdims=True)
        var = jnp.mean((y - mean) ** 2, axis=-1, keepdims=True)
        y = (y - mean) * lax.rsqrt(var + 1e-5)
        y = y * gamma[None, None, :] + beta[None, None, :]
        x = jnp.where(y >= 0, y, 0.01 * y)
    return x


if __name__ == "__main__":
    # Small shapes consistent with the module: Conv1d input is (N, C, L).
    batch = 2
    in_channels = 4
    length = 16
    hidden_dims = [8, 16]
    # latent_dim / map_size only affect the unused fc head.

    key = jax.random.PRNGKey(0)
    key, kx = jax.random.split(key)
    x = jax.random.normal(kx, (batch, in_channels, length), dtype=jnp.float32)

    params = init_encoder_params(key, in_channels, hidden_dims, length)

    out = jax.block_until_ready(encoder_forward(x, params))
    ref = encoder_forward_ref(x, params)

    assert out.shape == (batch, hidden_dims[-1], length // (2 ** len(hidden_dims)))
    assert jnp.max(jnp.abs(out - ref)) < 1e-4

    print("KERNEL_OK")
</pallas_src>

<mosaic_0001>
module attributes {stable_mosaic.version = 11 : i64} {
  func.func @_encoder_fused_kernel(%arg0: i32, %arg1: memref<1x4x16xf32, #tpu.memory_space<vmem>>, %arg2: memref<3x8x4xf32, #tpu.memory_space<vmem>>, %arg3: memref<3x16x8xf32, #tpu.memory_space<vmem>>, %arg4: memref<1x8xf32, #tpu.memory_space<vmem>>, %arg5: memref<1x8xf32, #tpu.memory_space<vmem>>, %arg6: memref<3x16x8xf32, #tpu.memory_space<vmem>>, %arg7: memref<3x8x4xf32, #tpu.memory_space<vmem>>, %arg8: memref<1x4xf32, #tpu.memory_space<vmem>>, %arg9: memref<1x4xf32, #tpu.memory_space<vmem>>, %arg10: memref<1x16x4xf32, #tpu.memory_space<vmem>>) attributes {dimension_semantics = [#tpu.dimension_semantics<parallel>], iteration_bounds = array<i64: 2>, scalar_prefetch = 0 : i64, scratch_operands = 0 : i64, tpu.core_type = #tpu.core_type<tc>, window_params = [{transform_indices = @transform_0, window_bounds = array<i64: 1, 4, 16>}, {pipeline_mode = #tpu.pipeline_mode<synchronous>, transform_indices = @transform_1, window_bounds = array<i64: 3, 8, 4>}, {pipeline_mode = #tpu.pipeline_mode<synchronous>, transform_indices = @transform_2, window_bounds = array<i64: 3, 16, 8>}, {pipeline_mode = #tpu.pipeline_mode<synchronous>, transform_indices = @transform_3, window_bounds = array<i64: 1, 8>}, {pipeline_mode = #tpu.pipeline_mode<synchronous>, transform_indices = @transform_4, window_bounds = array<i64: 1, 8>}, {pipeline_mode = #tpu.pipeline_mode<synchronous>, transform_indices = @transform_5, window_bounds = array<i64: 3, 16, 8>}, {pipeline_mode = #tpu.pipeline_mode<synchronous>, transform_indices = @transform_6, window_bounds = array<i64: 3, 8, 4>}, {pipeline_mode = #tpu.pipeline_mode<synchronous>, transform_indices = @transform_7, window_bounds = array<i64: 1, 4>}, {pipeline_mode = #tpu.pipeline_mode<synchronous>, transform_indices = @transform_8, window_bounds = array<i64: 1, 4>}, {transform_indices = @transform_9, window_bounds = array<i64: 1, 16, 4>}]} {
    %c0 = arith.constant 0 : index
    %c0_0 = arith.constant 0 : index
    %c0_1 = arith.constant 0 : index
    %0 = vector.load %arg1[%c0, %c0_0, %c0_1] : memref<1x4x16xf32, #tpu.memory_space<vmem>>, vector<1x4x16xf32>
    %1 = vector.shape_cast %0 : vector<1x4x16xf32> to vector<4x16xf32>
    %cst = arith.constant 0.000000e+00 : f32
    %2 = vector.broadcast %cst : f32 to vector<8x8xf32>
    %c0_2 = arith.constant 0 : index
    %c0_3 = arith.constant 0 : index
    %c0_4 = arith.constant 0 : index
    %3 = vector.load %arg3[%c0_2, %c0_3, %c0_4] : memref<3x16x8xf32, #tpu.memory_space<vmem>>, vector<1x16x8xf32>
    %4 = vector.shape_cast %3 : vector<1x16x8xf32> to vector<16x8xf32>
    %cst_5 = arith.constant dense<0.000000e+00> : vector<4x8xf32>
    %5 = tpu.matmul %1, %4, %cst_5 {dimension_numbers = #tpu.dot_dimension_numbers<[1], [0], [0], [1], [0, 0, 1, 1], [], []>} : vector<4x16xf32>, vector<16x8xf32>, vector<4x8xf32> -> vector<4x8xf32>
    %c0_6 = arith.constant 0 : index
    %c0_7 = arith.constant 0 : index
    %c0_8 = arith.constant 0 : index
    %6 = vector.load %arg2[%c0_6, %c0_7, %c0_8] : memref<3x8x4xf32, #tpu.memory_space<vmem>>, vector<1x8x4xf32>
    %7 = vector.shape_cast %6 : vector<1x8x4xf32> to vector<8x4xf32>
    %cst_9 = arith.constant dense<0.000000e+00> : vector<8x8xf32>
    %8 = tpu.matmul %7, %5, %cst_9 {dimension_numbers = #tpu.dot_dimension_numbers<[1], [0], [0], [1], [0, 0, 1, 1], [], []>} : vector<8x4xf32>, vector<4x8xf32>, vector<8x8xf32> -> vector<8x8xf32>
    %9 = arith.addf %2, %8 : vector<8x8xf32>
    %c1 = arith.constant 1 : index
    %c0_10 = arith.constant 0 : index
    %c0_11 = arith.constant 0 : index
    %10 = vector.load %arg3[%c1, %c0_10, %c0_11] : memref<3x16x8xf32, #tpu.memory_space<vmem>>, vector<1x16x8xf32>
    %11 = vector.shape_cast %10 : vector<1x16x8xf32> to vector<16x8xf32>
    %cst_12 = arith.constant dense<0.000000e+00> : vector<4x8xf32>
    %12 = tpu.matmul %1, %11, %cst_12 {dimension_numbers = #tpu.dot_dimension_numbers<[1], [0], [0], [1], [0, 0, 1, 1], [], []>} : vector<4x16xf32>, vector<16x8xf32>, vector<4x8xf32> -> vector<4x8xf32>
    %c1_13 = arith.constant 1 : index
    %c0_14 = arith.constant 0 : index
    %c0_15 = arith.constant 0 : index
    %13 = vector.load %arg2[%c1_13, %c0_14, %c0_15] : memref<3x8x4xf32, #tpu.memory_space<vmem>>, vector<1x8x4xf32>
    %14 = vector.shape_cast %13 : vector<1x8x4xf32> to vector<8x4xf32>
    %cst_16 = arith.constant dense<0.000000e+00> : vector<8x8xf32>
    %15 = tpu.matmul %14, %12, %cst_16 {dimension_numbers = #tpu.dot_dimension_numbers<[1], [0], [0], [1], [0, 0, 1, 1], [], []>} : vector<8x4xf32>, vector<4x8xf32>, vector<8x8xf32> -> vector<8x8xf32>
    %16 = arith.addf %9, %15 : vector<8x8xf32>
    %c2 = arith.constant 2 : index
    %c0_17 = arith.constant 0 : index
    %c0_18 = arith.constant 0 : index
    %17 = vector.load %arg3[%c2, %c0_17, %c0_18] : memref<3x16x8xf32, #tpu.memory_space<vmem>>, vector<1x16x8xf32>
    %18 = vector.shape_cast %17 : vector<1x16x8xf32> to vector<16x8xf32>
    %cst_19 = arith.constant dense<0.000000e+00> : vector<4x8xf32>
    %19 = tpu.matmul %1, %18, %cst_19 {dimension_numbers = #tpu.dot_dimension_numbers<[1], [0], [0], [1], [0, 0, 1, 1], [], []>} : vector<4x16xf32>, vector<16x8xf32>, vector<4x8xf32> -> vector<4x8xf32>
    %c2_20 = arith.constant 2 : index
    %c0_21 = arith.constant 0 : index
    %c0_22 = arith.constant 0 : index
    %20 = vector.load %arg2[%c2_20, %c0_21, %c0_22] : memref<3x8x4xf32, #tpu.memory_space<vmem>>, vector<1x8x4xf32>
    %21 = vector.shape_cast %20 : vector<1x8x4xf32> to vector<8x4xf32>
    %cst_23 = arith.constant dense<0.000000e+00> : vector<8x8xf32>
    %22 = tpu.matmul %21, %19, %cst_23 {dimension_numbers = #tpu.dot_dimension_numbers<[1], [0], [0], [1], [0, 0, 1, 1], [], []>} : vector<8x4xf32>, vector<4x8xf32>, vector<8x8xf32> -> vector<8x8xf32>
    %23 = arith.addf %16, %22 : vector<8x8xf32>
    %cst_24 = arith.constant dense<0.000000e+00> : vector<8xf32>
    %24 = vector.multi_reduction <add>, %23, %cst_24 [1] : vector<8x8xf32> to vector<8xf32>
    %25 = vector.shape_cast %24 : vector<8xf32> to vector<8x1xf32>
    %cst_25 = arith.constant 8.000000e+00 : f32
    %26 = vector.broadcast %cst_25 : f32 to vector<8x1xf32>
    %27 = arith.divf %25, %26 : vector<8x1xf32>
    %28 = vector.broadcast %27 : vector<8x1xf32> to vector<8x8xf32>
    %29 = arith.subf %23, %28 : vector<8x8xf32>
    %30 = arith.mulf %29, %29 : vector<8x8xf32>
    %cst_26 = arith.constant dense<0.000000e+00> : vector<8xf32>
    %31 = vector.multi_reduction <add>, %30, %cst_26 [1] : vector<8x8xf32> to vector<8xf32>
    %32 = vector.shape_cast %31 : vector<8xf32> to vector<8x1xf32>
    %cst_27 = arith.constant 8.000000e+00 : f32
    %33 = vector.broadcast %cst_27 : f32 to vector<8x1xf32>
    %34 = arith.divf %32, %33 : vector<8x1xf32>
    %cst_28 = arith.constant 9.99999974E-6 : f32
    %35 = vector.broadcast %cst_28 : f32 to vector<8x1xf32>
    %36 = arith.addf %34, %35 : vector<8x1xf32>
    %37 = math.rsqrt %36 : vector<8x1xf32>
    %38 = vector.broadcast %37 : vector<8x1xf32> to vector<8x8xf32>
    %39 = arith.mulf %29, %38 : vector<8x8xf32>
    %c0_29 = arith.constant 0 : index
    %c0_30 = arith.constant 0 : index
    %40 = vector.load %arg4[%c0_29, %c0_30] : memref<1x8xf32, #tpu.memory_space<vmem>>, vector<1x8xf32>
    %41 = vector.broadcast %40 : vector<1x8xf32> to vector<8x8xf32>
    %42 = arith.mulf %39, %41 : vector<8x8xf32>
    %c0_31 = arith.constant 0 : index
    %c0_32 = arith.constant 0 : index
    %43 = vector.load %arg5[%c0_31, %c0_32] : memref<1x8xf32, #tpu.memory_space<vmem>>, vector<1x8xf32>
    %44 = vector.broadcast %43 : vector<1x8xf32> to vector<8x8xf32>
    %45 = arith.addf %42, %44 : vector<8x8xf32>
    %cst_33 = arith.constant 0.000000e+00 : f32
    %46 = vector.broadcast %cst_33 : f32 to vector<8x8xf32>
    %47 = arith.cmpf oge, %45, %46 : vector<8x8xf32>
    %cst_34 = arith.constant 0.00999999977 : f32
    %48 = vector.broadcast %cst_34 : f32 to vector<8x8xf32>
    %49 = arith.mulf %48, %45 : vector<8x8xf32>
    %50 = arith.select %47, %45, %49 : vector<8x8xi1>, vector<8x8xf32>
    %cst_35 = arith.constant 0.000000e+00 : f32
    %51 = vector.broadcast %cst_35 : f32 to vector<16x4xf32>
    %c0_36 = arith.constant 0 : index
    %c0_37 = arith.constant 0 : index
    %c0_38 = arith.constant 0 : index
    %52 = vector.load %arg7[%c0_36, %c0_37, %c0_38] : memref<3x8x4xf32, #tpu.memory_space<vmem>>, vector<1x8x4xf32>
    %53 = vector.shape_cast %52 : vector<1x8x4xf32> to vector<8x4xf32>
    %cst_39 = arith.constant dense<0.000000e+00> : vector<8x4xf32>
    %54 = tpu.matmul %50, %53, %cst_39 {dimension_numbers = #tpu.dot_dimension_numbers<[1], [0], [0], [1], [0, 0, 1, 1], [], []>} : vector<8x8xf32>, vector<8x4xf32>, vector<8x4xf32> -> vector<8x4xf32>
    %c0_40 = arith.constant 0 : index
    %c0_41 = arith.constant 0 : index
    %c0_42 = arith.constant 0 : index
    %55 = vector.load %arg6[%c0_40, %c0_41, %c0_42] : memref<3x16x8xf32, #tpu.memory_space<vmem>>, vector<1x16x8xf32>
    %56 = vector.shape_cast %55 : vector<1x16x8xf32> to vector<16x8xf32>
    %cst_43 = arith.constant dense<0.000000e+00> : vector<16x4xf32>
    %57 = tpu.matmul %56, %54, %cst_43 {dimension_numbers = #tpu.dot_dimension_numbers<[1], [0], [0], [1], [0, 0, 1, 1], [], []>} : vector<16x8xf32>, vector<8x4xf32>, vector<16x4xf32> -> vector<16x4xf32>
    %58 = arith.addf %51, %57 : vector<16x4xf32>
    %c1_44 = arith.constant 1 : index
    %c0_45 = arith.constant 0 : index
    %c0_46 = arith.constant 0 : index
    %59 = vector.load %arg7[%c1_44, %c0_45, %c0_46] : memref<3x8x4xf32, #tpu.memory_space<vmem>>, vector<1x8x4xf32>
    %60 = vector.shape_cast %59 : vector<1x8x4xf32> to vector<8x4xf32>
    %cst_47 = arith.constant dense<0.000000e+00> : vector<8x4xf32>
    %61 = tpu.matmul %50, %60, %cst_47 {dimension_numbers = #tpu.dot_dimension_numbers<[1], [0], [0], [1], [0, 0, 1, 1], [], []>} : vector<8x8xf32>, vector<8x4xf32>, vector<8x4xf32> -> vector<8x4xf32>
    %c1_48 = arith.constant 1 : index
    %c0_49 = arith.constant 0 : index
    %c0_50 = arith.constant 0 : index
    %62 = vector.load %arg6[%c1_48, %c0_49, %c0_50] : memref<3x16x8xf32, #tpu.memory_space<vmem>>, vector<1x16x8xf32>
    %63 = vector.shape_cast %62 : vector<1x16x8xf32> to vector<16x8xf32>
    %cst_51 = arith.constant dense<0.000000e+00> : vector<16x4xf32>
    %64 = tpu.matmul %63, %61, %cst_51 {dimension_numbers = #tpu.dot_dimension_numbers<[1], [0], [0], [1], [0, 0, 1, 1], [], []>} : vector<16x8xf32>, vector<8x4xf32>, vector<16x4xf32> -> vector<16x4xf32>
    %65 = arith.addf %58, %64 : vector<16x4xf32>
    %c2_52 = arith.constant 2 : index
    %c0_53 = arith.constant 0 : index
    %c0_54 = arith.constant 0 : index
    %66 = vector.load %arg7[%c2_52, %c0_53, %c0_54] : memref<3x8x4xf32, #tpu.memory_space<vmem>>, vector<1x8x4xf32>
    %67 = vector.shape_cast %66 : vector<1x8x4xf32> to vector<8x4xf32>
    %cst_55 = arith.constant dense<0.000000e+00> : vector<8x4xf32>
    %68 = tpu.matmul %50, %67, %cst_55 {dimension_numbers = #tpu.dot_dimension_numbers<[1], [0], [0], [1], [0, 0, 1, 1], [], []>} : vector<8x8xf32>, vector<8x4xf32>, vector<8x4xf32> -> vector<8x4xf32>
    %c2_56 = arith.constant 2 : index
    %c0_57 = arith.constant 0 : index
    %c0_58 = arith.constant 0 : index
    %69 = vector.load %arg6[%c2_56, %c0_57, %c0_58] : memref<3x16x8xf32, #tpu.memory_space<vmem>>, vector<1x16x8xf32>
    %70 = vector.shape_cast %69 : vector<1x16x8xf32> to vector<16x8xf32>
    %cst_59 = arith.constant dense<0.000000e+00> : vector<16x4xf32>
    %71 = tpu.matmul %70, %68, %cst_59 {dimension_numbers = #tpu.dot_dimension_numbers<[1], [0], [0], [1], [0, 0, 1, 1], [], []>} : vector<16x8xf32>, vector<8x4xf32>, vector<16x4xf32> -> vector<16x4xf32>
    %72 = arith.addf %65, %71 : vector<16x4xf32>
    %cst_60 = arith.constant dense<0.000000e+00> : vector<16xf32>
    %73 = vector.multi_reduction <add>, %72, %cst_60 [1] : vector<16x4xf32> to vector<16xf32>
    %74 = vector.shape_cast %73 : vector<16xf32> to vector<16x1xf32>
    %cst_61 = arith.constant 4.000000e+00 : f32
    %75 = vector.broadcast %cst_61 : f32 to vector<16x1xf32>
    %76 = arith.divf %74, %75 : vector<16x1xf32>
    %77 = vector.broadcast %76 : vector<16x1xf32> to vector<16x4xf32>
    %78 = arith.subf %72, %77 : vector<16x4xf32>
    %79 = arith.mulf %78, %78 : vector<16x4xf32>
    %cst_62 = arith.constant dense<0.000000e+00> : vector<16xf32>
    %80 = vector.multi_reduction <add>, %79, %cst_62 [1] : vector<16x4xf32> to vector<16xf32>
    %81 = vector.shape_cast %80 : vector<16xf32> to vector<16x1xf32>
    %cst_63 = arith.constant 4.000000e+00 : f32
    %82 = vector.broadcast %cst_63 : f32 to vector<16x1xf32>
    %83 = arith.divf %81, %82 : vector<16x1xf32>
    %cst_64 = arith.constant 9.99999974E-6 : f32
    %84 = vector.broadcast %cst_64 : f32 to vector<16x1xf32>
    %85 = arith.addf %83, %84 : vector<16x1xf32>
    %86 = math.rsqrt %85 : vector<16x1xf32>
    %87 = vector.broadcast %86 : vector<16x1xf32> to vector<16x4xf32>
    %88 = arith.mulf %78, %87 : vector<16x4xf32>
    %c0_65 = arith.constant 0 : index
    %c0_66 = arith.constant 0 : index
    %89 = vector.load %arg8[%c0_65, %c0_66] : memref<1x4xf32, #tpu.memory_space<vmem>>, vector<1x4xf32>
    %90 = vector.broadcast %89 : vector<1x4xf32> to vector<16x4xf32>
    %91 = arith.mulf %88, %90 : vector<16x4xf32>
    %c0_67 = arith.constant 0 : index
    %c0_68 = arith.constant 0 : index
    %92 = vector.load %arg9[%c0_67, %c0_68] : memref<1x4xf32, #tpu.memory_space<vmem>>, vector<1x4xf32>
    %93 = vector.broadcast %92 : vector<1x4xf32> to vector<16x4xf32>
    %94 = arith.addf %91, %93 : vector<16x4xf32>
    %cst_69 = arith.constant 0.000000e+00 : f32
    %95 = vector.broadcast %cst_69 : f32 to vector<16x4xf32>
    %96 = arith.cmpf oge, %94, %95 : vector<16x4xf32>
    %cst_70 = arith.constant 0.00999999977 : f32
    %97 = vector.broadcast %cst_70 : f32 to vector<16x4xf32>
    %98 = arith.mulf %97, %94 : vector<16x4xf32>
    %99 = arith.select %96, %94, %98 : vector<16x4xi1>, vector<16x4xf32>
    %c0_71 = arith.constant 0 : index
    %c0_72 = arith.constant 0 : index
    %c0_73 = arith.constant 0 : index
    %100 = vector.load %arg10[%c0_71, %c0_72, %c0_73] : memref<1x16x4xf32, #tpu.memory_space<vmem>>, vector<1x16x4xf32>
    %101 = vector.shape_cast %100 : vector<1x16x4xf32> to vector<16x4xf32>
    %102 = vector.shape_cast %99 : vector<16x4xf32> to vector<1x16x4xf32>
    tpu.vector_store %arg10[%c0_71, %c0_72, %c0_73], %102 {strides = array<i32>} : memref<1x16x4xf32, #tpu.memory_space<vmem>>, vector<1x16x4xf32>,
    return
  }
  func.func @transform_0(%arg0: i32) -> (i32, i32, i32) {
    %c0_i32 = arith.constant 0 : i32
    %c0_i32_0 = arith.constant 0 : i32
    %c0_i32_1 = arith.constant 0 : i32
    return %arg0, %c0_i32, %c0_i32_0 : i32, i32, i32
  }
  func.func @transform_1(%arg0: i32) -> (i32, i32, i32) {
    %c0_i32 = arith.constant 0 : i32
    %c0_i32_0 = arith.constant 0 : i32
    %c0_i32_1 = arith.constant 0 : i32
    %c0_i32_2 = arith.constant 0 : i32
    return %c0_i32, %c0_i32_0, %c0_i32_1 : i32, i32, i32
  }
  func.func @transform_2(%arg0: i32) -> (i32, i32, i32) {
    %c0_i32 = arith.constant 0 : i32
    %c0_i32_0 = arith.constant 0 : i32
    %c0_i32_1 = arith.constant 0 : i32
    %c0_i32_2 = arith.constant 0 : i32
    return %c0_i32, %c0_i32_0, %c0_i32_1 : i32, i32, i32
  }
  func.func @transform_3(%arg0: i32) -> (i32, i32) {
    %c0_i32 = arith.constant 0 : i32
    %c0_i32_0 = arith.constant 0 : i32
    %c0_i32_1 = arith.constant 0 : i32
    return %c0_i32, %c0_i32_0 : i32, i32
  }
  func.func @transform_4(%arg0: i32) -> (i32, i32) {
    %c0_i32 = arith.constant 0 : i32
    %c0_i32_0 = arith.constant 0 : i32
    %c0_i32_1 = arith.constant 0 : i32
    return %c0_i32, %c0_i32_0 : i32, i32
  }
  func.func @transform_5(%arg0: i32) -> (i32, i32, i32) {
    %c0_i32 = arith.constant 0 : i32
    %c0_i32_0 = arith.constant 0 : i32
    %c0_i32_1 = arith.constant 0 : i32
    %c0_i32_2 = arith.constant 0 : i32
    return %c0_i32, %c0_i32_0, %c0_i32_1 : i32, i32, i32
  }
  func.func @transform_6(%arg0: i32) -> (i32, i32, i32) {
    %c0_i32 = arith.constant 0 : i32
    %c0_i32_0 = arith.constant 0 : i32
    %c0_i32_1 = arith.constant 0 : i32
    %c0_i32_2 = arith.constant 0 : i32
    return %c0_i32, %c0_i32_0, %c0_i32_1 : i32, i32, i32
  }
  func.func @transform_7(%arg0: i32) -> (i32, i32) {
    %c0_i32 = arith.constant 0 : i32
    %c0_i32_0 = arith.constant 0 : i32
    %c0_i32_1 = arith.constant 0 : i32
    return %c0_i32, %c0_i32_0 : i32, i32
  }
  func.func @transform_8(%arg0: i32) -> (i32, i32) {
    %c0_i32 = arith.constant 0 : i32
    %c0_i32_0 = arith.constant 0 : i32
    %c0_i32_1 = arith.constant 0 : i32
    return %c0_i32, %c0_i32_0 : i32, i32
  }
  func.func @transform_9(%arg0: i32) -> (i32, i32, i32) {
    %c0_i32 = arith.constant 0 : i32
    %c0_i32_0 = arith.constant 0 : i32
    %c0_i32_1 = arith.constant 0 : i32
    return %arg0, %c0_i32, %c0_i32_0 : i32, i32, i32
  }
}

</mosaic_0001>

<bundles_post_ra>
// kernel: encoder_forward.1
= control target key start
LH: loop header
LB: loop body
LE: loop exit
PB: predicated region body
PF: predicated region fallthrough
CT: control target
= control target key end

     0   :  { %s1638_s30 = smov 0   ;;  %s1772_s0 = inlined_call_operand.vmem [shape: f32[2,4,16], index: 0, kind: input, shape index: {}]   ;;  %s1773_s1 = inlined_call_operand.vmem [shape: f32[3,8,4], index: 1, kind: input, shape index: {}]   ;;  %s1774_s2 = inlined_call_operand.vmem [shape: f32[3,16,8], index: 2, kind: input, shape index: {}]   ;;  %s1775_s3 = inlined_call_operand.vmem [shape: f32[1,8], index: 3, kind: input, shape index: {}]   ;;  %s1776_s4 = inlined_call_operand.vmem [shape: f32[1,8], index: 4, kind: input, shape index: {}]   ;;  %s1777_s5 = inlined_call_operand.vmem [shape: f32[3,16,8], index: 5, kind: input, shape index: {}]   ;;  %s1778_s6 = inlined_call_operand.vmem [shape: f32[3,8,4], index: 6, kind: input, shape index: {}]   ;;  %s1779_s7 = inlined_call_operand.vmem [shape: f32[1,4], index: 7, kind: input, shape index: {}]   ;;  %s1780_s8 = inlined_call_operand.vmem [shape: f32[1,4], index: 8, kind: input, shape index: {}]   ;;  %s1781_s9 = inlined_call_operand.vmem [shape: f32[2,16,4], index: 9, kind: output, shape index: {}]  }
   0x1 LB: > { %s1402_s10 = sadd.s32 4294967295, %s1583_s30   ;;  %p1406_p0 = scmp.ge.s32.totalorder %s1583_s30, 1  ;;  %s1583_s30 = sphi %s1638_s30, %s19_s30  }
   0x2   : > { %p286_p1 = scmp.lt.s32.totalorder %s1583_s30, 3 }
   0x4   : > { %p287_p2 = pnand %p1406_p0, %p286_p1 }
   0x5   : > { %v331_v0 = vld [vmem:[%s1774_s2] sm:$0xff] (!%p287_p2)  ;;  %v332_v1 = vld [vmem:[%s1774_s2 + $0x8] sm:$0xff] (!%p287_p2)  ;;  %p321_p3 = scmp.lt.s32.totalorder (!%p287_p2), %s1402_s10, 1  ;;  %v1585_v2 = vmov (!%p287_p2), 0.0|0.0   ;;  %vm1586_vm0 = vmmov (!%p287_p2), 0   ;;  %v1587_v4 = vmov (!%p287_p2), 0.0  }
   0x6   : > { %290 = sbr.rel (%p287_p2) target bundleno = 1546 (0x60a), region = 56  ;;  %1543 = vmatprep.subr.bf16.mxu1 (!%p287_p2), %v1585_v2  ;;  %v1544_v3 = vpack.c.bf16 (!%p287_p2), %v332_v1, %v331_v0  ;;  %1481 = vmatprep.mubr.msk.f32.mxu1 (!%p287_p2), %vm1586_vm0, %v1587_v4  ;;  %v1411_v5 = vld [vmem:[%s1774_s2 + $0x10] sm:$0xff] (!%p287_p2)  ;;  %v1412_v6 = vld [vmem:[%s1774_s2 + $0x18] sm:$0xff] (!%p287_p2)  ;;  %vm333_vm1 = vcmask (!%p287_p2), 130048   ;;  %v1419_v8 = vld [vmem:[%s1774_s2 + $0x20] sm:$0xff] (!%p287_p2)  ;;  %vm487_vm2 = vcmask (!%p287_p2), 1043456  }
   0x7   : > { %1491 = vmatprep.subr.mxu0 (!%p287_p2), %v1587_v4  ;;  %1493 = vmatprep.mubr.msk.f32.mxu0 (!%p287_p2), %vm1586_vm0, %v1587_v4  ;;  %v1547_v7 = vpack.c.bf16 (!%p287_p2), %v1412_v6, %v1411_v5  ;;  %v1420_v9 = vld [vmem:[%s1774_s2 + $0x28] sm:$0xff] (!%p287_p2)  ;;  %vm483_vm3 = vcmask (!%p287_p2), 31744   ;;  %v407_v19 = vld [vmem:[%s1773_s1] sm:$0xff] (!%p287_p2)  ;;  %v1422_v20 = vld [vmem:[%s1773_s1 + $0x10] sm:$0xff] (!%p287_p2)  ;;  %vm789_vm4 = vcmask (!%p287_p2), 64512  }
   0x8   : > { %1545 = vmatpush3.bf16.msra.mxu1 (!%p287_p2), %v1544_v3  ;;  %v1550_v11 = vpack.c.bf16 (!%p287_p2), %v1420_v9, %v1419_v8  ;;  %v1414_v14 = vld [vmem:[%s1773_s1 + $0x8] sm:$0xff] (!%p287_p2)  ;;  %v823_v29 = vld [vmem:[%s1778_s6] sm:$0xff] (!%p287_p2)  ;;  %v1436_v42 = vld [vmem:[%s1778_s6 + $0x10] sm:$0xff] (!%p287_p2) }
   0x9   : > { %1546 = vmatprep.subr.bf16.mxu1 (!%p287_p2), %v1585_v2  ;;  %v1425_v34 = vld [vmem:[%s1775_s3] ss:$0 sm:$0xff] (!%p287_p2)  ;;  %v1428_v40 = vld [vmem:[%s1778_s6 + $0x8] sm:$0xff] (!%p287_p2)  ;;  %v1430_v43 = vld [vmem:[%s1777_s5 + $0x10] sm:$0xff] (!%p287_p2) }
   0xa   : > { %v1426_v36 = vld [vmem:[%s1776_s4] ss:$0 sm:$0xff] (!%p287_p2)  ;;  %v1431_v47 = vld [vmem:[%s1777_s5 + $0x18] sm:$0xff] (!%p287_p2)  ;;  %v898_v52 = vld [vmem:[%s1777_s5 + $0x8] sm:$0xff] (!%p287_p2) }
   0xb   : > { %v897_v49 = vld [vmem:[%s1777_s5] sm:$0xff] (!%p287_p2)  ;;  %v1439_v54 = vld [vmem:[%s1777_s5 + $0x28] sm:$0xff] (!%p287_p2) }
   0xc   : > { %v1438_v53 = vld [vmem:[%s1777_s5 + $0x20] sm:$0xff] (!%p287_p2) }
   0xd   : > { %s1783_s10 = smov (!%p321_p3, %s1402_s10), 1 }
   0xe   : > { %s1407_s19 = sshll.u32 %s1783_s10, 2  ;;  %s1446_s21 = sshll.u32 %s1783_s10, 4 }
   0xf   : > { %s324_s22 = scalar_lea.vmem %s1772_s0, %s1407_s19  ;;  %s329_s24 = scalar_lea.vmem %s1781_s9, %s1446_s21 }
  0x10   : > { %v330_v10 = vld [vmem:[%s324_s22] sm:$0xf] }
  0x11   : > { %1482 = vmatmul.mubr.msk.f32.vlgmr.msra.gmra.mrb[0].mxu1 %vm333_vm1, %v330_v10 }
  0x12   : > { %1548 = vmatpush3.bf16.msra.mxu1 %v1547_v7  ;;  %1488 = vmatprep.mubr.msk.f32.mxu1 %vm1586_vm0, %v1587_v4 }
  0x13   : > { %1549 = vmatprep.subr.bf16.mxu1 %v1585_v2 }
  0x15   : > { %1489 = vmatmul.mubr.msk.f32.vlgmr.msra.gmra.mrb[2].mxu1 %vm333_vm1, %v330_v10 }
  0x16   : > { %1551 = vmatpush3.bf16.msra.mxu1 %v1550_v11  ;;  %1505 = vmatprep.mubr.msk.f32.mxu1 %vm1586_vm0, %v1587_v4 }
  0x17   : > { %1513 = vmatprep.subr.mxu1 %v1587_v4 }
  0x19   : > { %1506 = vmatmul.mubr.msk.f32.vlgmr.msra.gmra.mrb[4].mxu1 %vm333_vm1, %v330_v10 }
  0x1a   : > { %1515 = vmatprep.mubr.msk.f32.mxu1 %vm1586_vm0, %v1587_v4  ;;  %1514 = vmatpush3.msra.mxu1 %v823_v29 }
  0x1b   : > { %1518 = vmatprep.subr.mxu1 %v1587_v4 }
  0xe4   : > { %v403_v12 = vpop.f32.mrb[0].mxu1 }
  0xe5   : > { %v1483_v13 = vpop.f32.mrb[1].mxu1 }
  0xe8   : > { %v477_v15 = vpop.f32.mrb[2].mxu1 }
  0xe9   : > { %v1490_v16 = vpop.f32.mrb[3].mxu1  ;;  %1492 = vmatpush3.msk.msra.mxu0 %vm487_vm2, %v477_v15 }
  0xea   : > { %1494 = vmatmul.mubr.msk.f32.vlgmr.msra.gmra.mrb[0].mxu0 %vm483_vm3, %v1414_v14  ;;  %1496 = vmatprep.subr.mxu0 %v1587_v4  ;;  %v1443_v14 = vld [vmem:[%s1780_s8] ss:$0 sm:$0xff] }
  0xeb   : > { %1497 = vmatpush3.msk.msra.mxu0 %vm487_vm2, %v403_v12  ;;  %1498 = vmatprep.mubr.msk.f32.mxu0 %vm1586_vm0, %v1587_v4  ;;  %v1442_v12 = vld [vmem:[%s1779_s7] ss:$0 sm:$0xff] }
  0xec   : > { %v706_v17 = vpop.f32.mrb[4].mxu1  ;;  %1508 = vmatprep.subr.mxu0 %v1587_v4 }
  0xed   : > { %v1507_v18 = vpop.f32.mrb[5].mxu1 }
  0xf2   : > { %1499 = vmatmul.mubr.msk.f32.vlgmr.msra.gmra.mrb[0].mxu0 %vm483_vm3, %v407_v19 }
  0xf3   : > { %1509 = vmatpush3.msk.msra.mxu0 %vm487_vm2, %v706_v17  ;;  %1510 = vmatprep.mubr.msk.f32.mxu0 %vm1586_vm0, %v1587_v4 }
  0xfa   : > { %1511 = vmatmul.mubr.msk.f32.vlgmr.msra.gmra.mrb[0].mxu0 %vm483_vm3, %v1422_v20 }
  0xfb   : > { %1525 = vmatprep.mubr.msk.f32.mxu0 %vm789_vm4, %v1430_v43 }
 0x1cd   : > { %v784_v21 = vpop.f32.mrb[0].mxu0 }
 0x1ce   : > { %v1512_v22 = vpop.f32.mrb[1].mxu0  ;;  %v790_v23 = vsel %vm789_vm4, %v784_v21, 0.0 }
 0x1cf   : > { %791 = vadd.xlane.f32.xlu0 %v790_v23 }
 0x25c   : > { %v792_v24 = vpop.xlane.xlu0 %791 }
 0x25d   : > { %v794_v25 = vmul.f32 0.125, %v792_v24 }
 0x25f   : > { %v795_v26 = vsub.f32 %v784_v21, %v794_v25 }
 0x261   : > { %v796_v27 = vmul.f32 %v795_v26, %v795_v26 }
 0x263   : > { %v797_v28 = vsel %vm789_vm4, %v796_v27, 0.0 }
 0x264   : > { %798 = vadd.xlane.f32.xlu0 %v797_v28 }
 0x2f1   : > { %v799_v30 = vpop.xlane.xlu0 %798 }
 0x2f2   : > { %v800_v31 = vmul.f32 0.125, %v799_v30 }
 0x2f4   : > { %v801_v32 = vadd.f32 1e-05, %v800_v31 }
 0x2f6   : > { %1571 = vrsqrt.f32 %v801_v32 }
 0x300   : > { %v1572_v33 = vpop.eup %1571 }
 0x301   : > { %v803_v35 = vmul.f32 %v1572_v33, %v795_v26 }
 0x303   : > { %v811_v37 = vmul.f32 %v1425_v34, %v803_v35 }
 0x305   : > { %v819_v38 = vadd.f32 %v1426_v36, %v811_v37 }
 0x307   : > { %vm820_vm5 = vcmp.ge.f32.partialorder %v819_v38, 0.0  ;;  %v821_v39 = vmul.f32 0.01, %v819_v38 }
 0x309   : > { %v822_v41 = vsel %vm820_vm5, %v819_v38, %v821_v39 }
 0x30a   : > { %1516 = vmatmul.mubr.msk.f32.vlgmr.msra.gmra.mrb[6].mxu1 %vm789_vm4, %v822_v41 }
 0x30b   : > { %1519 = vmatpush3.msra.mxu1 %v1428_v40  ;;  %1520 = vmatprep.mubr.msk.f32.mxu1 %vm1586_vm0, %v1587_v4 }
 0x30c   : > { %1533 = vmatprep.subr.mxu1 %v1587_v4 }
 0x30e   : > { %1521 = vmatmul.mubr.msk.f32.vlgmr.msra.gmra.mrb[8].mxu1 %vm789_vm4, %v822_v41 }
 0x30f   : > { %1534 = vmatpush3.msra.mxu1 %v1436_v42  ;;  %1535 = vmatprep.mubr.msk.f32.mxu1 %vm1586_vm0, %v1587_v4 }
 0x312   : > { %1536 = vmatmul.mubr.msk.f32.vlgmr.msra.gmra.mrb[10].mxu1 %vm789_vm4, %v822_v41 }
 0x3dd   : > { %v893_v44 = vpop.f32.mrb[6].mxu1 }
 0x3de   : > { %v1517_v45 = vpop.f32.mrb[7].mxu1 }
 0x3e1   : > { %v967_v46 = vpop.f32.mrb[8].mxu1 }
 0x3e2   : > { %v1522_v48 = vpop.f32.mrb[9].mxu1  ;;  %1523 = vmatprep.subr.mxu0 %v967_v46 }
 0x3e3   : > { %1524 = vmatpush3.msra.mxu0 %v967_v46 }
 0x3e4   : > { %1526 = vmatmul.mubr.msk.f32.vlgmr.msra.gmra.mrb[2].mxu0 %vm789_vm4, %v1431_v47  ;;  %1528 = vmatprep.subr.mxu0 %v893_v44 }
 0x3e5   : > { %1529 = vmatpush3.msra.mxu0 %v893_v44  ;;  %v1204_v50 = vpop.f32.mrb[10].mxu1  ;;  %1530 = vmatprep.mubr.msk.f32.mxu0 %vm789_vm4, %v897_v49 }
 0x3e6   : > { %v1537_v51 = vpop.f32.mrb[11].mxu1  ;;  %1538 = vmatprep.subr.mxu0 %v1204_v50 }
 0x3ec   : > { %1531 = vmatmul.mubr.msk.f32.vlgmr.msra.gmra.mrb[2].mxu0 %vm789_vm4, %v898_v52 }
 0x3ed   : > { %1539 = vmatpush3.msra.mxu0 %v1204_v50  ;;  %1540 = vmatprep.mubr.msk.f32.mxu0 %vm789_vm4, %v1438_v53 }
 0x3f4   : > { %1541 = vmatmul.mubr.msk.f32.vlgmr.msra.gmra.mrb[2].mxu0 %vm789_vm4, %v1439_v54 }
 0x4c7   : > { %v1542_v55 = vpop.f32.mrb[2].mxu0 }
 0x4c8   : > { %v1283_v56 = vpop.f32.mrb[3].mxu0  ;;  %v1297_v58 = vsel %vm483_vm3, %v1542_v55, 0.0 }
 0x4c9   : > { %v1294_v57 = vsel %vm483_vm3, %v1283_v56, 0.0 }
 0x4ca   : > { %1295 = vadd.xlane.f32.xlu1 %v1294_v57 }
 0x4ce   : > { %1298 = vadd.xlane.f32.xlu1 %v1297_v58 }
 0x557   : > { %v1296_v59 = vpop.xlane.xlu1 %1295 }
 0x558   : > { %v1301_v60 = vmul.f32 0.25, %v1296_v59 }
 0x55a   : > { %v1303_v61 = vsub.f32 %v1283_v56, %v1301_v60 }
 0x55b   : > { %v1299_v62 = vpop.xlane.xlu1 %1298 }
 0x55c   : > { %v1302_v63 = vmul.f32 0.25, %v1299_v62  ;;  %v1305_v0 = vmul.f32 %v1303_v61, %v1303_v61 }
 0x55e   : > { %v1304_v1 = vsub.f32 %v1542_v55, %v1302_v63  ;;  %v1307_v2 = vsel %vm483_vm3, %v1305_v0, 0.0 }
 0x55f   : > { %1308 = vadd.xlane.f32.xlu0 %v1307_v2 }
 0x560   : > { %v1306_v3 = vmul.f32 %v1304_v1, %v1304_v1 }
 0x562   : > { %v1310_v4 = vsel %vm483_vm3, %v1306_v3, 0.0 }
 0x563   : > { %1311 = vadd.xlane.f32.xlu1 %v1310_v4 }
 0x5ec   : > { %v1309_v5 = vpop.xlane.xlu0 %1308 }
 0x5ed   : > { %v1313_v6 = vmul.f32 0.25, %v1309_v5 }
 0x5ef   : > { %v1315_v7 = vadd.f32 1e-05, %v1313_v6 }
 0x5f0   : > { %v1312_v8 = vpop.xlane.xlu1 %1311 }
 0x5f1   : > { %1573 = vrsqrt.f32 %v1315_v7  ;;  %v1314_v9 = vmul.f32 0.25, %v1312_v8 }
 0x5f3   : > { %v1316_v10 = vadd.f32 1e-05, %v1314_v9 }
 0x5f5   : > { %1575 = vrsqrt.f32 %v1316_v10 }
 0x5fb   : > { %v1574_v11 = vpop.eup %1573 }
 0x5fc   : > { %v1319_v13 = vmul.f32 %v1574_v11, %v1303_v61 }
 0x5fe   : > { %v1328_v15 = vmul.f32 %v1442_v12, %v1319_v13 }
 0x5ff   : > { %v1576_v16 = vpop.eup %1575 }
 0x600   : > { %v1337_v17 = vadd.f32 %v1443_v14, %v1328_v15  ;;  %v1320_v18 = vmul.f32 %v1576_v16, %v1304_v1 }
 0x602   : > { %vm1339_vm6 = vcmp.ge.f32.partialorder %v1337_v17, 0.0  ;;  %v1341_v19 = vmul.f32 0.01, %v1337_v17  ;;  %v1329_v20 = vmul.f32 %v1442_v12, %v1320_v18 }
 0x604   : > { %v1343_v21 = vsel %vm1339_vm6, %v1337_v17, %v1341_v19  ;;  %v1338_v22 = vadd.f32 %v1443_v14, %v1329_v20 }
 0x605   : > { %1345 = vst.msk [vmem:[%s329_s24] sm:$0xff] %vm483_vm3, %v1343_v21 }
 0x606   : > { %vm1340_vm7 = vcmp.ge.f32.partialorder %v1338_v22, 0.0  ;;  %v1342_v23 = vmul.f32 0.01, %v1338_v22 }
 0x608   : > { %v1344_v24 = vsel %vm1340_vm7, %v1338_v22, %v1342_v23 }
 0x609   : > { %1346 = vst.msk [vmem:[%s329_s24 + $0x8] sm:$0xff] %vm483_vm3, %v1344_v24 }
 0x60a PF: > { %s19_s30 = sadd.s32 1, %s1583_s30  }
 0x60b   : > { %p16_p4 = scmp.ge.s32.totalorder %s19_s30, 4  }
 0x60d   :  { %18 = sbr.rel (!%p16_p4) target bundleno = 1 (0x1), region = 94 }

</bundles_post_ra>
